<compile_context>
chip_gen: v7x
topology: tpu7x:2x2x1
jax: 0.10.0
libtpu: 0.0.40
codegen_flags: <defaults>
</compile_context>

<pallas_src>
import functools

import jax
import jax.numpy as jnp
from jax.experimental import pallas as pl
from jax.experimental.pallas import tpu as pltpu

K_SUBCENTERS = 3
EPS = 1e-12  # torch.nn.functional.normalize default eps


def _round_up(x, m):
    return ((x + m - 1) // m) * m


def _device_vmem_bytes():
    """Physical VMEM per core; conservative (v7x, 64 MiB) fallback if unknown."""
    try:
        cap = int(getattr(pltpu.get_tpu_info(), "vmem_capacity_bytes", 0))
        if cap > 0:
            return cap
    except Exception:
        pass
    return 64 * 1024 * 1024


def _feat_swish_norm_kernel(x_ref, wf_ref, bf_ref, sn_ref):
    """feat Linear + Swish + row L2-normalize for one tile of rows.

    x_ref : (tile_m, C)  backbone feature rows (arc_dtype)
    wf_ref: (C, D)       feat Linear weight, pre-transposed, resident
    bf_ref: (1, D)       feat Linear bias (f32)
    sn_ref: (tile_m, D)  L2-normalized Swish(feat(x)) (arc_dtype)
    """
    h = jnp.dot(x_ref[...], wf_ref[...],
                preferred_element_type=jnp.float32) + bf_ref[...]
    s = h * jax.nn.sigmoid(h)                                   # Swish (EUP sigmoid)
    sumsq = jnp.sum(s * s, axis=-1, keepdims=True)
    # clamp ||s||^2 at EPS^2  ==  torch F.normalize clamp ||s|| at EPS
    inv_norm = jax.lax.rsqrt(jnp.maximum(sumsq, EPS * EPS))     # EUP rsqrt
    sn_ref[...] = (s * inv_norm).astype(sn_ref.dtype)


def _arc_max_kernel(sn_ref, wa_ref, out_ref, *, k, tile_n):
    """Cosine against k sub-centers + max, for one (out_dim tile, row tile) block.

    sn_ref : (tile_m, D)       normalized features (arc_dtype)
    wa_ref : (D, k * tile_n)   normalized sub-center weights, lane-concatenated:
                               column j*tile_n + f == class f of this tile, sub-center j
    out_ref: (tile_m, tile_n)  max-over-sub-center cosine logits (f32)
    """
    # One fused MXU matmul for all k sub-centers (one fill/drain instead of k),
    # f32 accumulation.
    c = jnp.dot(sn_ref[...], wa_ref[...], preferred_element_type=jnp.float32)
    cos = c[:, :tile_n]
    for j in range(1, k):                      # k is tiny/static; 128-aligned slices
        cos = jnp.maximum(cos, c[:, j * tile_n:(j + 1) * tile_n])
    out_ref[...] = cos.astype(out_ref.dtype)


def landmark_head(features, w_feat, b_feat, w_arc, out_dim, k=K_SUBCENTERS,
                  *, tile_m=None, tile_n=None, arc_dtype=jnp.bfloat16):
    """Head forward.

    features : (N, C)            pooled backbone features
    w_feat   : (D, C)            feat Linear weight (PyTorch layout)
    b_feat   : (D,)              feat Linear bias
    w_arc    : (out_dim * k, D)  sub-center ArcFace weight (PyTorch layout)
    arc_dtype: dtype of streamed operands; bf16 (default) halves HBM traffic of the
               dominant w_arc stream, all matmuls accumulate in f32.
    returns  : (N, out_dim) float32
    """
    n, c = features.shape
    d = w_feat.shape[0]
    assert w_arc.shape == (out_dim * k, d)
    isz = jnp.dtype(arc_dtype).itemsize

    # ---- tiling / VMEM budget (generation aware) --------------------------------
    # (Matches `if len_x == 1: x = x.view(1, len(x))`: the batch dim is always kept.)
    if tile_m is None:
        tile_m = min(256, _round_up(n, 8))
    n_pad = _round_up(n, tile_m)

    vmem_cap = _device_vmem_bytes()
    budget = (vmem_cap * 3) // 4            # ~48 MiB on v7x (64), ~96 MiB on v5e/v6e (128)
    if tile_n is None:
        # Largest lane-multiple tile_n whose double-buffered working set fits the
        # budget.  The wa block is (D, k*tile_n) -- the k=3 factor is included.
        fixed = 2 * tile_m * d * isz + (2 << 20)        # snorm double buffer + margin
        per_tn = 2 * d * k * isz + 2 * tile_m * 4       # wa + out per lane (x2 buffers)
        tn_max = max(128, (budget - fixed) // per_tn)
        tile_n = max(128, min((tn_max // 128) * 128, 8192, _round_up(out_dim, 128)))
    assert tile_n % 128 == 0, "tile_n must be a lane multiple"

    out_pad = _round_up(out_dim, tile_n)
    n_row_tiles = n_pad // tile_m
    n_out_tiles = out_pad // tile_n

    # ---- constant parameter prep (once, outside the kernels) --------------------
    x = features.astype(arc_dtype)
    if n_pad != n:
        x = jnp.pad(x, ((0, n_pad - n), (0, 0)))
    wf_t = jnp.transpose(w_feat).astype(arc_dtype)               # (C, D)
    bf = b_feat.reshape(1, d).astype(jnp.float32)                # (1, D)

    # L2-normalize the sub-center weights once, zero-pad out_dim to a tile_n multiple
    # (zero rows stay zero under the clamped normalize and their cosine columns are
    # sliced off below), and lay them out as (D, n_out_tiles * k * tile_n) so each
    # out-tile is a single contiguous lane-dense (D, k*tile_n) block:
    #   column ti*k*tile_n + j*tile_n + f  ==  w_arc row (ti*tile_n + f)*k + j.
    w32 = w_arc.astype(jnp.float32)
    wn = w32 / jnp.maximum(jnp.sqrt(jnp.sum(w32 * w32, axis=1, keepdims=True)), EPS)
    if out_pad != out_dim:
        wn = jnp.pad(wn, ((0, (out_pad - out_dim) * k), (0, 0)))
    wa = wn.reshape(n_out_tiles, tile_n, k, d)
    wa = jnp.transpose(wa, (3, 0, 2, 1)).reshape(d, n_out_tiles * k * tile_n)
    wa = wa.astype(arc_dtype)

    # ---- stage 1: feat Linear + Swish + L2-normalize -> snorm (n_pad, D) --------
    feat_need = (2 * tile_m * c * isz + 2 * c * d * isz + 2 * d * 4
                 + 2 * tile_m * d * isz)
    snorm = pl.pallas_call(
        _feat_swish_norm_kernel,
        out_shape=jax.ShapeDtypeStruct((n_pad, d), arc_dtype),
        grid_spec=pltpu.PrefetchScalarGridSpec(
            num_scalar_prefetch=0,
            grid=(n_row_tiles,),
            in_specs=[
                pl.BlockSpec((tile_m, c), lambda i: (i, 0)),   # feature rows
                pl.BlockSpec((c, d), lambda i: (0, 0)),        # feat weight (resident)
                pl.BlockSpec((1, d), lambda i: (0, 0)),        # feat bias
            ],
            out_specs=pl.BlockSpec((tile_m, d), lambda i: (i, 0)),
        ),
        compiler_params=pltpu.CompilerParams(
            dimension_semantics=("parallel",),
            vmem_limit_bytes=int(min(vmem_cap, max(feat_need + (4 << 20), 32 << 20))),
        ),
        cost_estimate=pl.CostEstimate(
            flops=2 * n_pad * c * d,
            transcendentals=n_pad * (d + 1),
            bytes_accessed=(n_pad * c * isz + c * d * isz + d * 4 + n_pad * d * isz),
        ),
    )(x, wf_t, bf)

    # ---- stage 2: cosine vs sub-centers + max over k ----------------------------
    arc_need = (2 * d * k * tile_n * isz      # wa tile, double buffered
                + 2 * tile_m * tile_n * 4     # out tile, double buffered
                + 2 * tile_m * d * isz)       # snorm tile, double buffered
    out = pl.pallas_call(
        functools.partial(_arc_max_kernel, k=k, tile_n=tile_n),
        out_shape=jax.ShapeDtypeStruct((n_pad, out_pad), jnp.float32),
        grid_spec=pltpu.PrefetchScalarGridSpec(
            num_scalar_prefetch=0,
            # out_dim axis OUTER: the dominant w_arc stream is read exactly once;
            # the small snorm (n_pad x D) is re-streamed per out tile instead.
            grid=(n_out_tiles, n_row_tiles),
            in_specs=[
                pl.BlockSpec((tile_m, d), lambda oi, ri: (ri, 0)),        # snorm tile
                pl.BlockSpec((d, k * tile_n), lambda oi, ri: (0, oi)),    # wa tile
            ],
            out_specs=pl.BlockSpec((tile_m, tile_n), lambda oi, ri: (ri, oi)),
        ),
        compiler_params=pltpu.CompilerParams(
            # No cross-step state: both axes are parallel, so megacore (v7x) can
            # split the out_dim axis even when the whole batch fits one row tile.
            dimension_semantics=("parallel", "parallel"),
            vmem_limit_bytes=int(min(vmem_cap, max(arc_need + (4 << 20), 32 << 20))),
        ),
        cost_estimate=pl.CostEstimate(
            flops=2 * n_pad * d * out_pad * k,
            transcendentals=0,
            bytes_accessed=(d * k * out_pad * isz            # w_arc streamed once
                            + n_out_tiles * n_pad * d * isz  # snorm per out tile
                            + n_pad * out_pad * 4),
        ),
    )(snorm, wa)

    return out[:n, :out_dim]


def landmark_head_reference(features, w_feat, b_feat, w_arc, out_dim, k=K_SUBCENTERS):
    """Pure-JAX reference mirroring the PyTorch forward, for correctness checks."""
    h = features @ w_feat.T + b_feat
    s = h * jax.nn.sigmoid(h)
    sn = s / jnp.maximum(jnp.linalg.norm(s, axis=-1, keepdims=True), EPS)
    wn = w_arc / jnp.maximum(jnp.linalg.norm(w_arc, axis=-1, keepdims=True), EPS)
    cos_all = sn @ wn.T                                  # (N, out_dim * k)
    return cos_all.reshape(-1, out_dim, k).max(axis=2)   # (N, out_dim)


if __name__ == "__main__":
    # Small, shape-consistent stand-ins:
    #   backbone feature channels C (2560 in ReXNetV1 x2.0) -> 256
    #   feat hidden dim D (fixed at 512 by the module)      -> 512
    #   out_dim (landmark classes)                          -> 512 and 300, k = 3
    N, C, D = 16, 256, 512

    key = jax.random.PRNGKey(0)
    k_x, k_wf, k_bf, k_wa = jax.random.split(key, 4)

    features = jax.random.normal(k_x, (N, C), dtype=jnp.float32)

    bound_f = 1.0 / (C ** 0.5)
    w_feat = jax.random.uniform(k_wf, (D, C), jnp.float32, -bound_f, bound_f)
    b_feat = jax.random.uniform(k_bf, (D,), jnp.float32, -bound_f, bound_f)

    stdv = 1.0 / (D ** 0.5)

    # 1) out_dim divisible by 128, all-f32 operands, explicit small tiles
    #    (exercises the (out_tile, row_tile) grid); tight tolerance.
    OUT_DIM = 512
    w_arc = jax.random.uniform(
        k_wa, (OUT_DIM * K_SUBCENTERS, D), jnp.float32, -stdv, stdv)
    ref = landmark_head_reference(features, w_feat, b_feat, w_arc, OUT_DIM)

    logits_f32 = landmark_head(features, w_feat, b_feat, w_arc, OUT_DIM,
                               tile_m=8, tile_n=128, arc_dtype=jnp.float32)
    logits_f32 = jax.block_until_ready(logits_f32)
    assert logits_f32.shape == (N, OUT_DIM)
    assert jnp.allclose(logits_f32, ref, atol=2e-4, rtol=2e-4), \
        "f32 mismatch vs reference"

    # 2) default path: bf16 streamed operands, auto tile sizes; loose tolerance.
    logits_bf16 = jax.block_until_ready(
        landmark_head(features, w_feat, b_feat, w_arc, OUT_DIM))
    assert logits_bf16.shape == (N, OUT_DIM)
    assert jnp.allclose(logits_bf16, ref, atol=5e-2), "bf16 mismatch vs reference"

    # 3) out_dim with no 128-aligned divisor (exercises the zero-pad + slice path).
    OUT_DIM2 = 300
    w_arc2 = jax.random.uniform(
        k_wa, (OUT_DIM2 * K_SUBCENTERS, D), jnp.float32, -stdv, stdv)
    ref2 = landmark_head_reference(features, w_feat, b_feat, w_arc2, OUT_DIM2)
    logits2 = jax.block_until_ready(
        landmark_head(features, w_feat, b_feat, w_arc2, OUT_DIM2))
    assert logits2.shape == (N, OUT_DIM2)
    assert jnp.allclose(logits2, ref2, atol=5e-2), \
        "padded-out_dim mismatch vs reference"

    print("KERNEL_OK")
</pallas_src>

<mosaic_0001>
module attributes {stable_mosaic.version = 11 : i64} {
  func.func @_feat_swish_norm_kernel(%arg0: i32, %arg1: memref<8x256xf32, #tpu.memory_space<vmem>>, %arg2: memref<256x512xf32, #tpu.memory_space<vmem>>, %arg3: memref<1x512xf32, #tpu.memory_space<vmem>>, %arg4: memref<8x512xf32, #tpu.memory_space<vmem>>) attributes {dimension_semantics = [#tpu.dimension_semantics<parallel>], iteration_bounds = array<i64: 2>, scalar_prefetch = 0 : i64, scratch_operands = 0 : i64, tpu.core_type = #tpu.core_type<tc>, window_params = [{transform_indices = @transform_0, window_bounds = array<i64: 8, 256>}, {pipeline_mode = #tpu.pipeline_mode<synchronous>, transform_indices = @transform_1, window_bounds = array<i64: 256, 512>}, {pipeline_mode = #tpu.pipeline_mode<synchronous>, transform_indices = @transform_2, window_bounds = array<i64: 1, 512>}, {transform_indices = @transform_3, window_bounds = array<i64: 8, 512>}]} {
    %c0 = arith.constant 0 : index
    %c0_0 = arith.constant 0 : index
    %0 = vector.load %arg1[%c0, %c0_0] : memref<8x256xf32, #tpu.memory_space<vmem>>, vector<8x256xf32>
    %c0_1 = arith.constant 0 : index
    %c0_2 = arith.constant 0 : index
    %1 = vector.load %arg2[%c0_1, %c0_2] : memref<256x512xf32, #tpu.memory_space<vmem>>, vector<256x512xf32>
    %cst = arith.constant dense<0.000000e+00> : vector<8x512xf32>
    %2 = tpu.matmul %0, %1, %cst {dimension_numbers = #tpu.dot_dimension_numbers<[1], [0], [0], [1], [0, 0, 1, 1], [], []>} : vector<8x256xf32>, vector<256x512xf32>, vector<8x512xf32> -> vector<8x512xf32>
    %c0_3 = arith.constant 0 : index
    %c0_4 = arith.constant 0 : index
    %3 = vector.load %arg3[%c0_3, %c0_4] : memref<1x512xf32, #tpu.memory_space<vmem>>, vector<1x512xf32>
    %4 = vector.broadcast %3 : vector<1x512xf32> to vector<8x512xf32>
    %5 = arith.addf %2, %4 : vector<8x512xf32>
    %6 = arith.negf %5 : vector<8x512xf32>
    %7 = math.exp %6 : vector<8x512xf32>
    %cst_5 = arith.constant 1.000000e+00 : f32
    %8 = vector.broadcast %cst_5 : f32 to vector<8x512xf32>
    %9 = arith.addf %8, %7 : vector<8x512xf32>
    %10 = arith.divf %8, %9 : vector<8x512xf32>
    %11 = arith.mulf %5, %10 : vector<8x512xf32>
    %12 = arith.mulf %11, %11 : vector<8x512xf32>
    %cst_6 = arith.constant dense<0.000000e+00> : vector<8xf32>
    %13 = vector.multi_reduction <add>, %12, %cst_6 [1] : vector<8x512xf32> to vector<8xf32>
    %14 = vector.shape_cast %13 : vector<8xf32> to vector<8x1xf32>
    %cst_7 = arith.constant 1.000000e-24 : f32
    %15 = vector.broadcast %cst_7 : f32 to vector<8x1xf32>
    %16 = arith.maximumf %14, %15 : vector<8x1xf32>
    %17 = math.rsqrt %16 : vector<8x1xf32>
    %18 = vector.broadcast %17 : vector<8x1xf32> to vector<8x512xf32>
    %19 = arith.mulf %11, %18 : vector<8x512xf32>
    %c0_8 = arith.constant 0 : index
    %c0_9 = arith.constant 0 : index
    %20 = vector.load %arg4[%c0_8, %c0_9] : memref<8x512xf32, #tpu.memory_space<vmem>>, vector<8x512xf32>
    tpu.vector_store %arg4[%c0_8, %c0_9], %19 {strides = array<i32>} : memref<8x512xf32, #tpu.memory_space<vmem>>, vector<8x512xf32>,
    return
  }
  func.func @transform_0(%arg0: i32) -> (i32, i32) {
    %c0_i32 = arith.constant 0 : i32
    %c0_i32_0 = arith.constant 0 : i32
    return %arg0, %c0_i32 : i32, i32
  }
  func.func @transform_1(%arg0: i32) -> (i32, i32) {
    %c0_i32 = arith.constant 0 : i32
    %c0_i32_0 = arith.constant 0 : i32
    %c0_i32_1 = arith.constant 0 : i32
    return %c0_i32, %c0_i32_0 : i32, i32
  }
  func.func @transform_2(%arg0: i32) -> (i32, i32) {
    %c0_i32 = arith.constant 0 : i32
    %c0_i32_0 = arith.constant 0 : i32
    %c0_i32_1 = arith.constant 0 : i32
    return %c0_i32, %c0_i32_0 : i32, i32
  }
  func.func @transform_3(%arg0: i32) -> (i32, i32) {
    %c0_i32 = arith.constant 0 : i32
    %c0_i32_0 = arith.constant 0 : i32
    return %arg0, %c0_i32 : i32, i32
  }
}

</mosaic_0001>

<bundles_post_ra>
// kernel: tpu_custom_call.1
= control target key start
LH: loop header
LB: loop body
LE: loop exit
PB: predicated region body
PF: predicated region fallthrough
CT: control target
= control target key end

     0   :  { %8 = vsyncpa [#allocation3], 0  ;;  %s1224_s0 = inlined_call_operand.hbm [shape: f32[16,256], index: 0, kind: input, shape index: {}]   ;;  %s1225_s1 = inlined_call_operand.hbm [shape: f32[256,512], index: 1, kind: input, shape index: {}]   ;;  %s1226_s2 = inlined_call_operand.vmem [shape: f32[1,512], index: 2, kind: input, shape index: {}]   ;;  %s1227_s3 = inlined_call_operand.hbm [shape: f32[16,512], index: 3, kind: output, shape index: {}]  }
   0x1   :  { %10 = vsyncpa [#allocation3 + $0x1], 0 }
   0x2   :  { %11 = vsyncpa [#allocation6], 0 }
   0x3   :  { %12 = vsyncpa [#allocation4], 0 }
   0x4   :  { %14 = vsyncpa [#allocation4 + $0x1], 0  ;;  %s1020_s12 = smov 0   ;;  %s1022_s13 = smov 0  }
   0x5   :  { %s1024_s14 = smov 0   ;;  %s1026_s15 = smov 0  }
   0x6 LB: > { %s1041_s16 = sadd.s32 4294967295, %s993_s15   ;;  %s638_s17 = sadd.s32 4294967294, %s993_s15   ;;  %s993_s15 = sphi %s1026_s15, %s1247_s15   ;;  %s989_s14 = sphi %s1024_s14, %s1246_s14   ;;  %s985_s13 = sphi %s1022_s13, %s1245_s13   ;;  %s981_s12 = sphi %s1020_s12, %s1244_s12  }
   0x7   : > { %p40_p0 = scmp.ne.s32.totalorder %s985_s13, %s981_s12  ;;  %p1228_p1 = scmp.eq.s32.totalorder %s1041_s16, 0 }
   0x8   : > { %p112_p3 = scmp.eq.s32.totalorder %s638_s17, 1  ;;  %p639_p5 = scmp.ge.s32.totalorder %s993_s15, 1 }
   0x9   : > { %p1050_p4 = por %p1228_p1, %p40_p0  ;;  %p119_p7 = scmp.lt.s32.totalorder %s993_s15, 3 }
   0xa   : > { %p1055_p6 = por %p112_p3, %p40_p0  ;;  %s995_s21 = smov [#allocation5]  }
   0xb   : > { %s1231_s18 = scalar_select %p1050_p4, 1, 0 }
   0xc   : > { %s1232_s19 = scalar_select %p1055_p6, 1, 0 }
   0xd   : > { %p1060_p8 = pnand %p639_p5, %p119_p7  ;;  %s131_s22 = sshll.u32 %s995_s21, 4  ;;  %s1064_s22 = int_to_ptr.vmem [resolvable:$true] %s131_s22 }
   0xe   : > { %s1076_s24 = sadd.s32 1, %s993_s15   ;;  %s27_s25 = sadd.s32 1, %s989_s14 }
   0xf   : > { %s1233_s20 = scalar_select %p1060_p8, 1, 0 }
  0x10   : > { %p796_p9 = pneg %p1060_p8  ;;  %s24_s26 = ssub.s32 %s993_s15, %s1076_s24 }
  0x11   : > { %s865_s29 = scalar_lea.hbm %s1225_s1, 16384 }
  0x12   : > { %p1071_p11 = pnand %p796_p9, %p1228_p1  ;;  %p866_p12 = scmp.ne.s32.totalorder %s1225_s1, %s865_s29 }
  0x13   : > { %p872_p5 = scmp.lt.u32.totalorder %s865_s29, %s1225_s1 }
  0x14   : > { %p867_p13 = pneg %p1071_p11 }
  0x16   : > { %p868_p0 = pnand %p867_p13, %p866_p12 }
  0x18   : > { %p869_p3 = pneg %p868_p0 }
  0x1a   : > { %p874_p7 = pnand %p872_p5, %p869_p3 }
  0x1c   : > { %877 = shalt.err (!%p874_p7)
}
  0x1d   : > { %s878_s7 = scalar_lea.vmem %s1064_s22, 16384  ;;  %p886_p2 = scmp.lt.s32.totalorder %s1064_s22, %s1064_s22 }
  0x1e   : > { %p879_p9 = scmp.ne.s32.totalorder %s1064_s22, %s878_s7  ;;  %p887_p6 = scmp.lt.s32.totalorder %s878_s7, %s878_s7 }
  0x20   : > { %p881_p10 = pnand %p879_p9, %p867_p13  ;;  %p888_p4 = por %p887_p6, %p886_p2 }
  0x22   : > { %p882_p1 = pneg %p881_p10 }
  0x24   : > { %p889_p8 = pnand %p888_p4, %p882_p1 }
  0x26   : > { %892 = shalt.err (!%p889_p8)
}
  0x27   : > { %s996_s8 = smov 512   ;;  %s997_s9 = smov 32  }
  0x28   : > { %799 = dma.hbm_to_vmem [thread:$0]  (!%p1071_p11), %s1225_s1, 16384, %s1064_s22, [#allocation6], %s996_s8, %s996_s8, %s997_s9  }
  0x29   : > { %p25_p2 = scmp.eq.s32.totalorder %s24_s26, 0  ;;  %p34_p1 = scmp.ne.s32.totalorder %s989_s14, %s985_s13 }
  0x2a   : > { %p35_p4 = scmp.eq.s32.totalorder %s993_s15, 0  ;;  %p809_p6 = scmp.lt.s32.totalorder %s993_s15, 2 }
  0x2b   : > { %s1107_s17 = scalar_select %p25_p2, %s989_s14, %s27_s25  }
  0x2c   : > { %p36_p8 = por %p35_p4, %p34_p1  ;;  %p1235_p10 = scmp.eq.s32.totalorder %s1041_s16, 1 }
  0x2d   : > { %s148_s27 = sand.u32 1, %s989_s14   ;;  %s658_s28 = sshll.u32 %s993_s15, 8 }
  0x2e   : > { %p1111_p12 = por %p1235_p10, %p34_p1  ;;  %s642_s29 = sshll.u32 %s148_s27, 4 }
  0x2f   : > { %s1120_s4 = scalar_lea.hbm %s1224_s0, %s658_s28  ;;  %s152_s22 = scalar_lea.vmem [#allocation2], %s642_s29 }
  0x30   : > { %s160_s25 = sshll.u32 %s152_s22, 4  ;;  %p1122_p11 = pnand %p809_p6, %p36_p8  ;;  %s1126_s25 = int_to_ptr.vmem [resolvable:$true] %s160_s25 }
  0x31   : > { %s149_s5 = scalar_lea.sflag [#allocation3], %s148_s27  ;;  %s893_s6 = scalar_lea.hbm %s1120_s4, 256 }
  0x32   : > { %p894_p13 = scmp.ne.s32.totalorder %s1120_s4, %s893_s6  ;;  %p895_p0 = pneg %p1122_p11 }
  0x33   : > { %s898_s9 = scalar_lea.hbm %s1224_s0, 512  ;;  %p899_p7 = scmp.lt.u32.totalorder %s1120_s4, %s1224_s0 }
  0x34   : > { %p896_p3 = pnand %p895_p0, %p894_p13  ;;  %p900_p9 = scmp.lt.u32.totalorder %s898_s9, %s893_s6 }
  0x35   : > { %p902_p1 = scmp.lt.u32.totalorder %s893_s6, %s1120_s4 }
  0x36   : > { %p897_p5 = pneg %p896_p3  ;;  %p901_p2 = por %p900_p9, %p899_p7 }
  0x38   : > { %p903_p4 = por %p902_p1, %p901_p2 }
  0x3a   : > { %p904_p6 = pnand %p903_p4, %p897_p5 }
  0x3c   : > { %907 = shalt.err (!%p904_p6)
}
  0x3d   : > { %s908_s27 = scalar_lea.vmem %s1126_s25, 256  ;;  %s998_s28 = smov [#allocation2]  }
  0x3e   : > { %p909_p8 = scmp.ne.s32.totalorder %s1126_s25, %s908_s27  ;;  %s913_s29 = sshll.u32 %s998_s28, 4  ;;  %s914_s29 = int_to_ptr.vmem [resolvable:$false] %s913_s29 }
  0x3f   : > { %s915_s23 = scalar_lea.vmem %s914_s29, 512  ;;  %p916_p3 = scmp.lt.s32.totalorder %s1126_s25, %s914_s29 }
  0x40   : > { %p911_p10 = pnand %p909_p8, %p895_p0  ;;  %p917_p7 = scmp.lt.s32.totalorder %s915_s23, %s908_s27 }
  0x42   : > { %p912_p13 = pneg %p911_p10  ;;  %p918_p9 = por %p917_p7, %p916_p3 }
  0x44   : > { %p919_p2 = pnand %p918_p9, %p912_p13 }
  0x46   : > { %922 = shalt.err (!%p919_p2)
}
  0x47   : > { %803 = dma.hbm_to_vmem [thread:$0]  (!%p1122_p11), %s1120_s4, 256, %s1126_s25, %s149_s5  }
  0x48   : > { %p1238_p5 = scmp.ne.s32.totalorder %s1233_s20, 0 }
  0x49   : > { %s1156_s30 = sand.u32 (!%p1238_p5), 1, %s985_s13   ;;  %p1239_p0 = scmp.ne.s32.totalorder (!%p1238_p5), %s1231_s18, 0 }
  0x4a   : > { %169 = sbr.rel (%p1238_p5) target bundleno = 577 (0x241), region = 32  ;;  %s646_s22 = sshll.u32 (!%p1238_p5), %s1156_s30, 4 }
  0x4b   : > { %s172_s6 = scalar_lea.sflag (!%p1238_p5), [#allocation3], %s1156_s30  ;;  %s1160_s7 = scalar_lea.vmem (!%p1238_p5), [#allocation2], %s646_s22 }
  0x51   : > { %968 = dma.done.wait (%p1239_p0), %s172_s6, 256  }
  0x52   : > { %970 = vsyncadd (%p1239_p0), %s172_s6, 4294967040  ;;  %p1240_p11 = scmp.eq.s32.totalorder %s1041_s16, 0 }
  0x54   : > { %972 = dma.done.wait (%p1240_p11), [#allocation6], 16384   ;;  %p1241_p1 = pmov %p1240_p11 }
  0x55   : > { %v205_v0 = vld [vmem:[#allocation5 + $0x8] sm:$0xff]  ;;  %v207_v2 = vld [vmem:[#allocation5 + $0x18] sm:$0xff]  ;;  %v204_v5 = vld [vmem:[#allocation5] sm:$0xff]  ;;  %s648_s4 = sshll.u32 %s1156_s30, 5  ;;  %s659_s25 = sshll.u32 %s1041_s16, 9 }
  0x56   : > { %974 = vsyncadd (%p1241_p1), [#allocation6], 4294950912  ;;  %v209_v1 = vld [vmem:[#allocation5 + $0x28] sm:$0xff]  ;;  %v211_v4 = vld [vmem:[#allocation5 + $0x38] sm:$0xff]  ;;  %s201_s26 = scalar_lea.vmem [#allocation7], %s648_s4  ;;  %s1180_s10 = scalar_lea.hbm %s1227_s3, %s659_s25 }
  0x57   : > { %v660_v3 = vpack.c.bf16 %v209_v1, %v205_v0  ;;  %v208_v6 = vld [vmem:[#allocation5 + $0x20] sm:$0xff]  ;;  %v724_v7 = vpack.c.bf16 %v211_v4, %v207_v2  ;;  %v206_v9 = vld [vmem:[#allocation5 + $0x10] sm:$0xff]  ;;  %v213_v11 = vld [vmem:[#allocation5 + $0x48] sm:$0xff]  ;;  %s558_s5 = sshll.u32 %s201_s26, 4  ;;  %s544_s16 = scalar_lea.sflag [#allocation4], %s1156_s30  ;;  %s1182_s5 = int_to_ptr.vmem [resolvable:$true] %s558_s5 }
  0x58   : > { %v662_v8 = vpack.c.bf16 %v208_v6, %v204_v5  ;;  %v210_v10 = vld [vmem:[#allocation5 + $0x30] sm:$0xff]  ;;  %v217_v13 = vld [vmem:[#allocation5 + $0x68] sm:$0xff]  ;;  %v215_v14 = vld [vmem:[#allocation5 + $0x58] sm:$0xff]  ;;  %s923_s11 = scalar_lea.vmem %s1182_s5, 512  ;;  %s999_s27 = smov [#allocation7]  }
  0x59   : > { %661 = vmatprep.subr.bf16.mxu0 %v660_v3  ;;  %v726_v12 = vpack.c.bf16 %v210_v10, %v206_v9  ;;  %v219_v15 = vld [vmem:[#allocation5 + $0x78] sm:$0xff]  ;;  %725 = vmatprep.subr.bf16.mxu1 %v724_v7  ;;  %v664_v16 = vpack.c.bf16 %v217_v13, %v213_v11  ;;  %v212_v18 = vld [vmem:[#allocation5 + $0x40] sm:$0xff]  ;;  %v214_v20 = vld [vmem:[#allocation5 + $0x50] sm:$0xff]  ;;  %p924_p4 = scmp.ne.s32.totalorder %s1182_s5, %s923_s11  ;;  %s927_s28 = sshll.u32 %s999_s27, 4  ;;  %s928_s28 = int_to_ptr.vmem [resolvable:$false] %s927_s28 }
  0x5a   : > { %663 = vmatpush1.bf16.msra.mxu0 %v662_v8  ;;  %v728_v17 = vpack.c.bf16 %v219_v15, %v215_v14  ;;  %v216_v19 = vld [vmem:[#allocation5 + $0x60] sm:$0xff]  ;;  %v218_v22 = vld [vmem:[#allocation5 + $0x70] sm:$0xff]  ;;  %v221_v23 = vld [vmem:[#allocation5 + $0x88] sm:$0xff]  ;;  %s929_s29 = scalar_lea.vmem %s928_s28, 1024  ;;  %p930_p10 = scmp.lt.s32.totalorder %s1182_s5, %s928_s28 }
  0x5b   : > { %727 = vmatpush1.bf16.msra.mxu1 %v726_v12  ;;  %v666_v21 = vpack.c.bf16 %v216_v19, %v212_v18  ;;  %v225_v24 = vld [vmem:[#allocation5 + $0xa8] sm:$0xff]  ;;  %665 = vmatprep.subr.bf16.mxu0 %v664_v16  ;;  %v730_v25 = vpack.c.bf16 %v218_v22, %v214_v20  ;;  %v223_v27 = vld [vmem:[#allocation5 + $0x98] sm:$0xff]  ;;  %v220_v29 = vld [vmem:[#allocation5 + $0x80] sm:$0xff]  ;;  %p925_p6 = pnand %p924_p4, %p1111_p12  ;;  %p931_p13 = scmp.lt.s32.totalorder %s929_s29, %s923_s11 }
  0x5c   : > { %729 = vmatprep.subr.bf16.mxu1 %v728_v17  ;;  %v668_v26 = vpack.c.bf16 %v225_v24, %v221_v23  ;;  %v227_v28 = vld [vmem:[#allocation5 + $0xb8] sm:$0xff]  ;;  %v224_v31 = vld [vmem:[#allocation5 + $0xa0] sm:$0xff]  ;;  %v222_v32 = vld [vmem:[#allocation5 + $0x90] sm:$0xff] }
  0x5d   : > { %v732_v30 = vpack.c.bf16 %v227_v28, %v223_v27  ;;  %v226_v33 = vld [vmem:[#allocation5 + $0xb0] sm:$0xff]  ;;  %v670_v34 = vpack.c.bf16 %v224_v31, %v220_v29  ;;  %v229_v35 = vld [vmem:[#allocation5 + $0xc8] sm:$0xff]  ;;  %v231_v37 = vld [vmem:[#allocation5 + $0xd8] sm:$0xff]  ;;  %p926_p8 = pneg %p925_p6  ;;  %p932_p3 = por %p931_p13, %p930_p10 }
  0x5e   : > { %667 = vmatpush1.bf16.msra.mxu0 %v666_v21  ;;  %v233_v36 = vld [vmem:[#allocation5 + $0xe8] sm:$0xff]  ;;  %v734_v38 = vpack.c.bf16 %v226_v33, %v222_v32  ;;  %v235_v40 = vld [vmem:[#allocation5 + $0xf8] sm:$0xff]  ;;  %v228_v41 = vld [vmem:[#allocation5 + $0xc0] sm:$0xff] }
  0x5f   : > { %731 = vmatpush1.bf16.msra.mxu1 %v730_v25  ;;  %669 = vmatprep.subr.bf16.mxu0 %v668_v26  ;;  %v672_v39 = vpack.c.bf16 %v233_v36, %v229_v35  ;;  %v232_v42 = vld [vmem:[#allocation5 + $0xe0] sm:$0xff]  ;;  %v736_v43 = vpack.c.bf16 %v235_v40, %v231_v37  ;;  %v230_v44 = vld [vmem:[#allocation5 + $0xd0] sm:$0xff]  ;;  %v237_v46 = vld [vmem:[#allocation5 + $0x108] sm:$0xff]  ;;  %p933_p7 = pnand %p932_p3, %p926_p8 }
  0x60   : > { %733 = vmatprep.subr.bf16.mxu1 %v732_v30  ;;  %v234_v45 = vld [vmem:[#allocation5 + $0xf0] sm:$0xff]  ;;  %v241_v47 = vld [vmem:[#allocation5 + $0x128] sm:$0xff]  ;;  %v239_v48 = vld [vmem:[#allocation5 + $0x118] sm:$0xff]  ;;  %v674_v50 = vpack.c.bf16 %v232_v42, %v228_v41 }
  0x61   : > { %v243_v49 = vld [vmem:[#allocation5 + $0x138] sm:$0xff]  ;;  %v738_v51 = vpack.c.bf16 %v234_v45, %v230_v44  ;;  %v676_v52 = vpack.c.bf16 %v241_v47, %v237_v46  ;;  %v236_v53 = vld [vmem:[#allocation5 + $0x100] sm:$0xff]  ;;  %v238_v55 = vld [vmem:[#allocation5 + $0x110] sm:$0xff] }
  0x62   : > { %671 = vmatpush1.bf16.msra.mxu0 %v670_v34  ;;  %v240_v54 = vld [vmem:[#allocation5 + $0x120] sm:$0xff]  ;;  %v740_v56 = vpack.c.bf16 %v243_v49, %v239_v48  ;;  %v242_v57 = vld [vmem:[#allocation5 + $0x130] sm:$0xff]  ;;  %v245_v58 = vld [vmem:[#allocation5 + $0x148] sm:$0xff] }
  0x63   : > { %735 = vmatpush1.bf16.msra.mxu1 %v734_v38  ;;  %673 = vmatprep.subr.bf16.mxu0 %v672_v39  ;;  %v249_v59 = vld [vmem:[#allocation5 + $0x168] sm:$0xff]  ;;  %v247_v60 = vld [vmem:[#allocation5 + $0x158] sm:$0xff]  ;;  %v678_v62 = vpack.c.bf16 %v240_v54, %v236_v53  ;;  %v742_v63 = vpack.c.bf16 %v242_v57, %v238_v55  ;;  %v244_v1 = vld [vmem:[#allocation5 + $0x140] sm:$0xff] }
  0x64   : > { %737 = vmatprep.subr.bf16.mxu1 %v736_v43  ;;  %v251_v61 = vld [vmem:[#allocation5 + $0x178] sm:$0xff]  ;;  %v680_v0 = vpack.c.bf16 %v249_v59, %v245_v58  ;;  %v248_v2 = vld [vmem:[#allocation5 + $0x160] sm:$0xff]  ;;  %v246_v3 = vld [vmem:[#allocation5 + $0x150] sm:$0xff] }
  0x65   : > { %v744_v4 = vpack.c.bf16 %v251_v61, %v247_v60  ;;  %v250_v5 = vld [vmem:[#allocation5 + $0x170] sm:$0xff]  ;;  %v253_v6 = vld [vmem:[#allocation5 + $0x188] sm:$0xff]  ;;  %v255_v8 = vld [vmem:[#allocation5 + $0x198] sm:$0xff]  ;;  %v682_v10 = vpack.c.bf16 %v248_v2, %v244_v1 }
  0x66   : > { %675 = vmatpush1.bf16.msra.mxu0 %v674_v50  ;;  %v257_v7 = vld [vmem:[#allocation5 + $0x1a8] sm:$0xff]  ;;  %v259_v9 = vld [vmem:[#allocation5 + $0x1b8] sm:$0xff]  ;;  %v746_v11 = vpack.c.bf16 %v250_v5, %v246_v3  ;;  %v252_v13 = vld [vmem:[#allocation5 + $0x180] sm:$0xff] }
  0x67   : > { %739 = vmatpush1.bf16.msra.mxu1 %v738_v51  ;;  %677 = vmatprep.subr.bf16.mxu0 %v676_v52  ;;  %v684_v12 = vpack.c.bf16 %v257_v7, %v253_v6  ;;  %v256_v14 = vld [vmem:[#allocation5 + $0x1a0] sm:$0xff]  ;;  %v254_v15 = vld [vmem:[#allocation5 + $0x190] sm:$0xff]  ;;  %v748_v16 = vpack.c.bf16 %v259_v9, %v255_v8  ;;  %v261_v18 = vld [vmem:[#allocation5 + $0x1c8] sm:$0xff] }
  0x68   : > { %741 = vmatprep.subr.bf16.mxu1 %v740_v56  ;;  %v258_v17 = vld [vmem:[#allocation5 + $0x1b0] sm:$0xff]  ;;  %v265_v19 = vld [vmem:[#allocation5 + $0x1e8] sm:$0xff]  ;;  %v263_v20 = vld [vmem:[#allocation5 + $0x1d8] sm:$0xff]  ;;  %v686_v22 = vpack.c.bf16 %v256_v14, %v252_v13 }
  0x69   : > { %v267_v21 = vld [vmem:[#allocation5 + $0x1f8] sm:$0xff]  ;;  %v750_v23 = vpack.c.bf16 %v258_v17, %v254_v15  ;;  %v688_v24 = vpack.c.bf16 %v265_v19, %v261_v18  ;;  %v260_v25 = vld [vmem:[#allocation5 + $0x1c0] sm:$0xff]  ;;  %v262_v27 = vld [vmem:[#allocation5 + $0x1d0] sm:$0xff] }
  0x6a   : > { %679 = vmatpush1.bf16.msra.mxu0 %v678_v62  ;;  %v264_v26 = vld [vmem:[#allocation5 + $0x1e0] sm:$0xff]  ;;  %v752_v28 = vpack.c.bf16 %v267_v21, %v263_v20  ;;  %v266_v29 = vld [vmem:[#allocation5 + $0x1f0] sm:$0xff]  ;;  %v269_v30 = vld [vmem:[#allocation5 + $0x208] sm:$0xff] }
  0x6b   : > { %743 = vmatpush1.bf16.msra.mxu1 %v742_v63  ;;  %681 = vmatprep.subr.bf16.mxu0 %v680_v0  ;;  %v273_v31 = vld [vmem:[#allocation5 + $0x228] sm:$0xff]  ;;  %v271_v32 = vld [vmem:[#allocation5 + $0x218] sm:$0xff]  ;;  %v690_v34 = vpack.c.bf16 %v264_v26, %v260_v25  ;;  %v754_v35 = vpack.c.bf16 %v266_v29, %v262_v27  ;;  %v268_v37 = vld [vmem:[#allocation5 + $0x200] sm:$0xff] }
  0x6c   : > { %745 = vmatprep.subr.bf16.mxu1 %v744_v4  ;;  %v275_v33 = vld [vmem:[#allocation5 + $0x238] sm:$0xff]  ;;  %v692_v36 = vpack.c.bf16 %v273_v31, %v269_v30  ;;  %v272_v38 = vld [vmem:[#allocation5 + $0x220] sm:$0xff]  ;;  %v270_v39 = vld [vmem:[#allocation5 + $0x210] sm:$0xff] }
  0x6d   : > { %v756_v40 = vpack.c.bf16 %v275_v33, %v271_v32  ;;  %v274_v41 = vld [vmem:[#allocation5 + $0x230] sm:$0xff]  ;;  %v277_v42 = vld [vmem:[#allocation5 + $0x248] sm:$0xff]  ;;  %v279_v44 = vld [vmem:[#allocation5 + $0x258] sm:$0xff]  ;;  %v694_v46 = vpack.c.bf16 %v272_v38, %v268_v37 }
  0x6e   : > { %683 = vmatpush1.bf16.msra.mxu0 %v682_v10  ;;  %v281_v43 = vld [vmem:[#allocation5 + $0x268] sm:$0xff]  ;;  %v283_v45 = vld [vmem:[#allocation5 + $0x278] sm:$0xff]  ;;  %v758_v47 = vpack.c.bf16 %v274_v41, %v270_v39  ;;  %v276_v49 = vld [vmem:[#allocation5 + $0x240] sm:$0xff] }
  0x6f   : > { %747 = vmatpush1.bf16.msra.mxu1 %v746_v11  ;;  %685 = vmatprep.subr.bf16.mxu0 %v684_v12  ;;  %v696_v48 = vpack.c.bf16 %v281_v43, %v277_v42  ;;  %v280_v50 = vld [vmem:[#allocation5 + $0x260] sm:$0xff]  ;;  %v278_v51 = vld [vmem:[#allocation5 + $0x250] sm:$0xff]  ;;  %v760_v52 = vpack.c.bf16 %v283_v45, %v279_v44  ;;  %v285_v54 = vld [vmem:[#allocation5 + $0x288] sm:$0xff] }
  0x70   : > { %749 = vmatprep.subr.bf16.mxu1 %v748_v16  ;;  %v282_v53 = vld [vmem:[#allocation5 + $0x270] sm:$0xff]  ;;  %v289_v55 = vld [vmem:[#allocation5 + $0x2a8] sm:$0xff]  ;;  %v287_v56 = vld [vmem:[#allocation5 + $0x298] sm:$0xff]  ;;  %v698_v58 = vpack.c.bf16 %v280_v50, %v276_v49 }
  0x71   : > { %v291_v57 = vld [vmem:[#allocation5 + $0x2b8] sm:$0xff]  ;;  %v762_v59 = vpack.c.bf16 %v282_v53, %v278_v51  ;;  %v700_v60 = vpack.c.bf16 %v289_v55, %v285_v54  ;;  %v284_v61 = vld [vmem:[#allocation5 + $0x280] sm:$0xff]  ;;  %v286_v63 = vld [vmem:[#allocation5 + $0x290] sm:$0xff] }
  0x72   : > { %687 = vmatpush1.bf16.msra.mxu0 %v686_v22  ;;  %v288_v62 = vld [vmem:[#allocation5 + $0x2a0] sm:$0xff]  ;;  %v764_v0 = vpack.c.bf16 %v291_v57, %v287_v56  ;;  %v290_v1 = vld [vmem:[#allocation5 + $0x2b0] sm:$0xff]  ;;  %v293_v2 = vld [vmem:[#allocation5 + $0x2c8] sm:$0xff] }
  0x73   : > { %751 = vmatpush1.bf16.msra.mxu1 %v750_v23  ;;  %689 = vmatprep.subr.bf16.mxu0 %v688_v24  ;;  %v297_v3 = vld [vmem:[#allocation5 + $0x2e8] sm:$0xff]  ;;  %v295_v4 = vld [vmem:[#allocation5 + $0x2d8] sm:$0xff]  ;;  %v702_v6 = vpack.c.bf16 %v288_v62, %v284_v61  ;;  %v292_v7 = vld [vmem:[#allocation5 + $0x2c0] sm:$0xff]  ;;  %v766_v8 = vpack.c.bf16 %v290_v1, %v286_v63 }
  0x74   : > { %753 = vmatprep.subr.bf16.mxu1 %v752_v28  ;;  %v299_v5 = vld [vmem:[#allocation5 + $0x2f8] sm:$0xff]  ;;  %v704_v9 = vpack.c.bf16 %v297_v3, %v293_v2  ;;  %v296_v10 = vld [vmem:[#allocation5 + $0x2e0] sm:$0xff]  ;;  %v294_v11 = vld [vmem:[#allocation5 + $0x2d0] sm:$0xff]  ;;  %v334_v2 = vlaneseq }
  0x75   : > { %v298_v12 = vld [vmem:[#allocation5 + $0x2f0] sm:$0xff]  ;;  %v768_v13 = vpack.c.bf16 %v299_v5, %v295_v4  ;;  %v301_v14 = vld [vmem:[#allocation5 + $0x308] sm:$0xff]  ;;  %v303_v17 = vld [vmem:[#allocation5 + $0x318] sm:$0xff]  ;;  %v706_v19 = vpack.c.bf16 %v296_v10, %v292_v7 }
  0x76   : > { %691 = vmatpush1.bf16.msra.mxu0 %v690_v34  ;;  %v305_v15 = vld [vmem:[#allocation5 + $0x328] sm:$0xff]  ;;  %v307_v18 = vld [vmem:[#allocation5 + $0x338] sm:$0xff]  ;;  %v770_v20 = vpack.c.bf16 %v298_v12, %v294_v11  ;;  %v300_v22 = vld [vmem:[#allocation5 + $0x300] sm:$0xff]  ;;  %v335_v3 = vshrl.u32 %v334_v2, 7 }
  0x77   : > { %755 = vmatpush1.bf16.msra.mxu1 %v754_v35  ;;  %693 = vmatprep.subr.bf16.mxu0 %v692_v36  ;;  %v203_v16 = vld [vmem:[%s1160_s7 + $0x8] sm:$0xff]  ;;  %v708_v21 = vpack.c.bf16 %v305_v15, %v301_v14  ;;  %v304_v23 = vld [vmem:[#allocation5 + $0x320] sm:$0xff]  ;;  %v302_v24 = vld [vmem:[#allocation5 + $0x310] sm:$0xff]  ;;  %v772_v25 = vpack.c.bf16 %v307_v18, %v303_v17 }
  0x78   : > { %757 = vmatprep.subr.bf16.mxu1 %v756_v40  ;;  %418 = vmatprep.mubr.f32.mxu0 %v203_v16  ;;  %v306_v26 = vld [vmem:[#allocation5 + $0x330] sm:$0xff]  ;;  %v309_v27 = vld [vmem:[#allocation5 + $0x348] sm:$0xff]  ;;  %v311_v29 = vld [vmem:[#allocation5 + $0x358] sm:$0xff]  ;;  %v710_v31 = vpack.c.bf16 %v304_v23, %v300_v22  ;;  %v336_v4 = vsub.s32 0, %v335_v3  ;;  %v340_v7 = vsub.s32 1, %v335_v3 }
  0x79   : > { %489 = vmatprep.mubr.f32.mxu1 %v203_v16  ;;  %v313_v28 = vld [vmem:[#allocation5 + $0x368] sm:$0xff]  ;;  %v315_v30 = vld [vmem:[#allocation5 + $0x378] sm:$0xff]  ;;  %v774_v32 = vpack.c.bf16 %v306_v26, %v302_v24  ;;  %v308_v34 = vld [vmem:[#allocation5 + $0x340] sm:$0xff] }
  0x7a   : > { %695 = vmatpush1.bf16.msra.mxu0 %v694_v46  ;;  %v712_v33 = vpack.c.bf16 %v313_v28, %v309_v27  ;;  %v312_v35 = vld [vmem:[#allocation5 + $0x360] sm:$0xff]  ;;  %v310_v36 = vld [vmem:[#allocation5 + $0x350] sm:$0xff]  ;;  %v776_v37 = vpack.c.bf16 %v315_v30, %v311_v29  ;;  %v317_v39 = vld [vmem:[#allocation5 + $0x388] sm:$0xff] }
  0x7b   : > { %759 = vmatpush1.bf16.msra.mxu1 %v758_v47  ;;  %697 = vmatprep.subr.bf16.mxu0 %v696_v48  ;;  %v314_v38 = vld [vmem:[#allocation5 + $0x370] sm:$0xff]  ;;  %v321_v40 = vld [vmem:[#allocation5 + $0x3a8] sm:$0xff]  ;;  %v319_v41 = vld [vmem:[#allocation5 + $0x398] sm:$0xff]  ;;  %v714_v43 = vpack.c.bf16 %v312_v35, %v308_v34 }
  0x7c   : > { %761 = vmatprep.subr.bf16.mxu1 %v760_v52  ;;  %v323_v42 = vld [vmem:[#allocation5 + $0x3b8] sm:$0xff]  ;;  %v778_v44 = vpack.c.bf16 %v314_v38, %v310_v36  ;;  %v716_v45 = vpack.c.bf16 %v321_v40, %v317_v39  ;;  %v316_v46 = vld [vmem:[#allocation5 + $0x380] sm:$0xff]  ;;  %v318_v48 = vld [vmem:[#allocation5 + $0x390] sm:$0xff] }
  0x7d   : > { %v320_v47 = vld [vmem:[#allocation5 + $0x3a0] sm:$0xff]  ;;  %v780_v49 = vpack.c.bf16 %v323_v42, %v319_v41  ;;  %v322_v50 = vld [vmem:[#allocation5 + $0x3b0] sm:$0xff]  ;;  %v325_v51 = vld [vmem:[#allocation5 + $0x3c8] sm:$0xff] }
  0x7e   : > { %699 = vmatpush1.bf16.msra.mxu0 %v698_v58  ;;  %v329_v52 = vld [vmem:[#allocation5 + $0x3e8] sm:$0xff]  ;;  %v327_v53 = vld [vmem:[#allocation5 + $0x3d8] sm:$0xff]  ;;  %v718_v55 = vpack.c.bf16 %v320_v47, %v316_v46  ;;  %v782_v56 = vpack.c.bf16 %v322_v50, %v318_v48  ;;  %v324_v58 = vld [vmem:[#allocation5 + $0x3c0] sm:$0xff] }
  0x7f   : > { %763 = vmatpush1.bf16.msra.mxu1 %v762_v59  ;;  %701 = vmatprep.subr.bf16.mxu0 %v700_v60  ;;  %v331_v54 = vld [vmem:[#allocation5 + $0x3f8] sm:$0xff]  ;;  %v720_v57 = vpack.c.bf16 %v329_v52, %v325_v51  ;;  %v328_v59 = vld [vmem:[#allocation5 + $0x3e0] sm:$0xff]  ;;  %v326_v61 = vld [vmem:[#allocation5 + $0x3d0] sm:$0xff] }
  0x80   : > { %765 = vmatprep.subr.bf16.mxu1 %v764_v0  ;;  %v784_v60 = vpack.c.bf16 %v331_v54, %v327_v53  ;;  %v330_v62 = vld [vmem:[#allocation5 + $0x3f0] sm:$0xff]  ;;  %v722_v63 = vpack.c.bf16 %v328_v59, %v324_v58  ;;  %v332_v5 = vld [vmem:[%s1226_s2] sm:$0xf] }
  0x81   : > { %v786_v0 = vpack.c.bf16 %v330_v62, %v326_v61  ;;  %v202_v1 = vld [vmem:[%s1160_s7] sm:$0xff]  ;;  %v341_v11 = vrot.slane %v332_v5, %v340_v7 }
  0x82   : > { %703 = vmatpush1.bf16.msra.mxu0 %v702_v6  ;;  %v344_v6 = vsub.s32 2, %v335_v3 }
  0x83   : > { %767 = vmatpush1.bf16.msra.mxu1 %v766_v8  ;;  %705 = vmatprep.subr.bf16.mxu0 %v704_v9  ;;  %v348_v8 = vsub.s32 3, %v335_v3  ;;  %v337_v9 = vrot.slane %v332_v5, %v336_v4 }
  0x84   : > { %769 = vmatprep.subr.bf16.mxu1 %v768_v13  ;;  %v345_v10 = vrot.slane %v332_v5, %v344_v6 }
  0x85   : > { %v349_v12 = vrot.slane %v332_v5, %v348_v8 }
  0x86   : > { %707 = vmatpush1.bf16.msra.mxu0 %v706_v19 }
  0x87   : > { %771 = vmatpush1.bf16.msra.mxu1 %v770_v20  ;;  %709 = vmatprep.subr.bf16.mxu0 %v708_v21 }
  0x88   : > { %773 = vmatprep.subr.bf16.mxu1 %v772_v25 }
  0x8a   : > { %711 = vmatpush1.bf16.msra.mxu0 %v710_v31 }
  0x8b   : > { %775 = vmatpush1.bf16.msra.mxu1 %v774_v32  ;;  %713 = vmatprep.subr.bf16.mxu0 %v712_v33 }
  0x8c   : > { %777 = vmatprep.subr.bf16.mxu1 %v776_v37 }
  0x8e   : > { %715 = vmatpush1.bf16.msra.mxu0 %v714_v43 }
  0x8f   : > { %779 = vmatpush1.bf16.msra.mxu1 %v778_v44  ;;  %717 = vmatprep.subr.bf16.mxu0 %v716_v45 }
  0x90   : > { %781 = vmatprep.subr.bf16.mxu1 %v780_v49 }
  0x92   : > { %719 = vmatpush1.bf16.msra.mxu0 %v718_v55 }
  0x93   : > { %783 = vmatpush1.bf16.msra.mxu1 %v782_v56  ;;  %721 = vmatprep.subr.bf16.mxu0 %v720_v57 }
  0x94   : > { %785 = vmatprep.subr.bf16.mxu1 %v784_v60 }
  0x96   : > { %723 = vmatpush1.bf16.msra.mxu0 %v722_v63 }
  0x97   : > { %787 = vmatpush1.bf16.msra.mxu1 %v786_v0 }
  0x99   : > { %419 = vmatmul.mubr.f32.vlgmr.msra.gmra.mrb[0].mxu0 %v202_v1 }
  0x9a   : > { %490 = vmatmul.mubr.f32.vlgmr.msra.gmra.mrb[0].mxu1 %v202_v1 }
 0x16c   : > { %v420_v13 = vpop.f32.mrb[0].mxu0 }
 0x16d   : > { %v421_v14 = vadd.f32 %v420_v13, %v337_v9  ;;  %v491_v15 = vpop.f32.mrb[0].mxu1  ;;  %v422_v16 = vpop.f32.mrb[1].mxu0 }
 0x16e   : > { %v492_v17 = vadd.f32 %v491_v15, %v345_v10  ;;  %v423_v18 = vadd.f32 %v422_v16, %v341_v11  ;;  %v493_v19 = vpop.f32.mrb[1].mxu1 }
 0x16f   : > { %v649_v20 = vmul.f32 -1.442695, %v421_v14  ;;  %v494_v21 = vadd.f32 %v493_v19, %v349_v12 }
 0x170   : > { %v651_v22 = vmul.f32 -1.442695, %v492_v17  ;;  %v650_v23 = vmul.f32 -1.442695, %v423_v18 }
 0x171   : > { %847 = vpow2.f32 %v649_v20  ;;  %v652_v24 = vmul.f32 -1.442695, %v494_v21 }
 0x172   : > { %849 = vpow2.f32 %v651_v22 }
 0x173   : > { %851 = vpow2.f32 %v650_v23 }
 0x174   : > { %853 = vpow2.f32 %v652_v24 }
 0x17b   : > { %v848_v25 = vpop.eup %847 }
 0x17c   : > { %v850_v26 = vpop.eup %849  ;;  %v508_v27 = vadd.f32 1.0, %v848_v25 }
 0x17d   : > { %v852_v28 = vpop.eup %851  ;;  %v510_v29 = vadd.f32 1.0, %v850_v26 }
 0x17e   : > { %v854_v30 = vpop.eup %853  ;;  %855 = vrcp.f32 %v508_v27  ;;  %v509_v31 = vadd.f32 1.0, %v852_v28 }
 0x17f   : > { %857 = vrcp.f32 %v510_v29  ;;  %v511_v32 = vadd.f32 1.0, %v854_v30 }
 0x180   : > { %859 = vrcp.f32 %v509_v31 }
 0x181   : > { %861 = vrcp.f32 %v511_v32 }
 0x188   : > { %v856_v33 = vpop.eup %855 }
 0x189   : > { %v858_v34 = vpop.eup %857  ;;  %v520_v35 = vmul.f32 %v856_v33, %v421_v14 }
 0x18a   : > { %v860_v36 = vpop.eup %859  ;;  %v522_v39 = vmul.f32 %v858_v34, %v492_v17 }
 0x18b   : > { %v862_v37 = vpop.eup %861  ;;  %v524_v38 = vmul.f32 %v520_v35, %v520_v35  ;;  %v521_v40 = vmul.f32 %v860_v36, %v423_v18 }
 0x18c   : > { %v523_v42 = vmul.f32 %v862_v37, %v494_v21  ;;  %v526_v43 = vmul.f32 %v522_v39, %v522_v39 }
 0x18d   : > { %v525_v41 = vmul.f32 %v521_v40, %v521_v40 }
 0x18e   : > { %v527_v45 = vmul.f32 %v523_v42, %v523_v42 }
 0x18f   : > { %v528_v44 = vadd.f32 %v525_v41, %v524_v38 }
 0x191   : > { %v529_v46 = vadd.f32 %v528_v44, %v526_v43 }
 0x193   : > { %v530_v47 = vadd.f32 %v529_v46, %v527_v45 }
 0x195   : > { %531 = vadd.xlane.f32.xlu0 %v530_v47 }
 0x222   : > { %v532_v48 = vpop.xlane.xlu0 %531 }
 0x223   : > { %v533_v49 = vmax.f32 %v532_v48, 1e-24 }
 0x225   : > { %863 = vrsqrt.f32 %v533_v49 }
 0x22f   : > { %v864_v50 = vpop.eup %863 }
 0x230   : > { %v535_v51 = vmul.f32 %v864_v50, %v520_v35  ;;  %v536_v52 = vmul.f32 %v864_v50, %v521_v40  ;;  %v537_v53 = vmul.f32 %v864_v50, %v522_v39  ;;  %v538_v54 = vmul.f32 %v864_v50, %v523_v42 }
 0x232   : > { %539 = vst [vmem:[%s201_s26] sm:$0xff] %v535_v51  ;;  %540 = vst [vmem:[%s201_s26 + $0x8] sm:$0xff] %v536_v52 }
 0x233   : > { %541 = vst [vmem:[%s201_s26 + $0x10] sm:$0xff] %v537_v53  ;;  %542 = vst [vmem:[%s201_s26 + $0x18] sm:$0xff] %v538_v54 }
 0x234   : > { %936 = shalt.err (!%p933_p7)
}
 0x235   : > { %s937_s23 = scalar_lea.hbm %s1180_s10, 512  ;;  %s941_s6 = scalar_lea.hbm %s1227_s3, 1024 }
 0x236   : > { %p938_p9 = scmp.ne.s32.totalorder %s1180_s10, %s937_s23  ;;  %p942_p0 = scmp.lt.u32.totalorder %s1180_s10, %s1227_s3 }
 0x237   : > { %p943_p11 = scmp.lt.u32.totalorder %s941_s6, %s937_s23  ;;  %p945_p4 = scmp.lt.u32.totalorder %s937_s23, %s1180_s10 }
 0x238   : > { %p939_p2 = pnand %p938_p9, %p1111_p12 }
 0x239   : > { %p944_p1 = por %p943_p11, %p942_p0 }
 0x23a   : > { %p940_p5 = pneg %p939_p2 }
 0x23b   : > { %p946_p6 = por %p945_p4, %p944_p1 }
 0x23d   : > { %p947_p8 = pnand %p946_p6, %p940_p5 }
 0x23f   : > { %950 = shalt.err (!%p947_p8)
}
 0x240   : > { %794 = dma.vmem_to_hbm [thread:$0]  (%p1111_p12), %s1182_s5, 512, %s1180_s10, %s544_s16  }
 0x241 PF: > { %s570_s20 = sand.u32 1, %s981_s12   ;;  %p1242_p10 = scmp.ne.s32.totalorder %s1232_s19, 0 }
 0x242   : > { %p1243_p13 = scmp.ge.s32.totalorder %s993_s15, 2  ;;  %s571_s4 = scalar_lea.sflag [#allocation4], %s570_s20 }
 0x244   : > { %p805_p3 = pnand %p1243_p13, %p1242_p10 }
 0x246   : > { %976 = dma.done.wait (!%p805_p3), %s571_s4, 512  }
 0x247   : > { %978 = vsyncadd (!%p805_p3), %s571_s4, 4294966784  ;;  %p17_p7 = scmp.ge.s32.totalorder %s1076_s24, 4   ;;  %s1244_s12 = smov %s985_s13 }
 0x248   : > { %s1245_s13 = smov %s989_s14  ;;  %s1246_s14 = smov %s1107_s17 }
 0x249   : > { %s1247_s15 = smov %s1076_s24  ;;  %19 = sbr.rel (!%p17_p7) target bundleno = 6 (0x6), region = 81 }
 0x250   :  { %576 = vsyncpa [#allocation3], 1 }
 0x251   :  { %578 = vsyncpa [#allocation3 + $0x1], 1 }
 0x252   :  { %579 = vsyncpa [#allocation6], 1 }
 0x253   :  { %580 = vsyncpa [#allocation4], 1 }
 0x254   :  { %582 = vsyncpa [#allocation4 + $0x1], 1 }

</bundles_post_ra>
